<compile_context>
chip_gen: v6e
topology: v6e:2x2x1
jax: 0.10.0
libtpu: 0.0.40
codegen_flags: <defaults>
</compile_context>

<pallas_src>
import jax
import jax.numpy as jnp
from jax.experimental import pallas as pl
from jax.experimental.pallas import tpu as pltpu

EPS = 1e-4


def _cdiv(a, b):
    return -(-a // b)


def _round_up(a, b):
    return _cdiv(a, b) * b


def _round_down(a, b):
    return (a // b) * b


def _tpu_generation_info():
    """Best-effort (vmem_capacity_bytes, tensorcores_per_pallas_call)."""
    vmem = 64 * 1024 * 1024        # conservative default (v7x per-TC VMEM)
    cores = 1
    try:
        info = pltpu.get_tpu_info()
        v = getattr(info, "vmem_capacity_bytes", None)
        if isinstance(v, int) and v > 0:
            vmem = v
        for attr in ("num_cores", "core_count", "tensorcore_count"):
            c = getattr(info, attr, None)
            if isinstance(c, int) and c > 0:
                cores = max(1, min(2, c))
                break
    except Exception:
        pass
    if cores == 1:
        try:
            kind = jax.devices()[0].device_kind.lower()
            # v7x (and megacore v4/v5p) expose 2 TensorCores to one pallas_call.
            if ("v7" in kind) or ("v4" in kind) or ("v5p" in kind):
                cores = 2
        except Exception:
            pass
    return vmem, cores


def cae_kernel(nf_ref, x_ref, mu_ref, inv_s2_ref, out_ref):
    # nf_ref:     (1,) int32 SMEM   number of valid (folded) rows of x
    # x_ref:      (TN, D_eff)       VMEM   rows of x (possibly lane-folded)
    # mu_ref:     (1, D_eff) f32    VMEM
    # inv_s2_ref: (1, D_eff) f32    VMEM
    # out_ref:    (8, D_eff) f32    VMEM   per-shard resident partial-sum block
    s = pl.program_id(0)
    k = pl.program_id(1)
    tn, d_eff = x_ref.shape

    @pl.when(k == 0)
    def _init():
        out_ref[...] = jnp.zeros_like(out_ref)

    x = x_ref[...].astype(jnp.float32)
    diff = x - mu_ref[...]
    sq = diff * inv_s2_ref[...] * diff                     # (tn, d_eff) f32

    n_valid = nf_ref[0]
    start = (s * pl.num_programs(1) + k) * tn              # logical row start
    needs_mask = start + tn > n_valid

    @pl.when(needs_mask)
    def _tail():
        rows = jax.lax.broadcasted_iota(jnp.int32, (tn, 1), 0) + start
        sq_m = jnp.where(rows < n_valid, sq, 0.0)
        out_ref[...] += jnp.sum(sq_m.reshape(tn // 8, 8, d_eff), axis=0)

    @pl.when(jnp.logical_not(needs_mask))
    def _body():
        # Strided reduce to 8 sublanes: pure VALU adds across vregs (no XLU).
        out_ref[...] += jnp.sum(sq.reshape(tn // 8, 8, d_eff), axis=0)


def single_class_cae_forward(x, mu, sigma, *, num_shards=None, tn_max=8192):
    """x: (N, D) or (D,); mu, sigma: (D,). Returns scalar f32."""
    if x.ndim == 1:
        x = x.reshape(1, -1)
    n, d = x.shape
    if n == 0:
        raise ValueError("SingleClassCaE forward needs at least one row.")

    mu32 = mu.astype(jnp.float32)
    sigma32 = sigma.astype(jnp.float32)

    vmem_cap, n_cores = _tpu_generation_info()
    if num_shards is None:
        num_shards = n_cores

    # ---- layout plumbing (wrapper side, no HBM copies) --------------------
    # Fold rows into the lane axis when D is a small divisor of 128 AND the
    # fold divides N exactly (so the reshape is a free contiguous view).
    fold = 1
    if d < 128 and 128 % d == 0 and n % (128 // d) == 0:
        fold = 128 // d
    d_eff = d * fold
    n_f = n // fold
    xf = x.reshape(n_f, d_eff)                    # contiguous -> no copy

    mu_fold = jnp.tile(mu32, fold).reshape(1, d_eff)
    inv_s2_fold = jnp.tile(1.0 / (sigma32 * sigma32), fold).reshape(1, d_eff)

    # ---- generation-aware tile sizing --------------------------------------
    # v7x: 64 MiB VMEM  -> 32 MiB scoped limit, <=8 MiB x blocks (x2 buffers).
    # v5e/v6e: 128 MiB  -> 64 MiB scoped limit, up to 16 MiB x blocks.
    vmem_limit = max(16 << 20, min(64 << 20, vmem_cap // 2))
    block_budget = max(1 << 20, min(16 << 20, vmem_limit // 4))

    itemsize = jnp.dtype(x.dtype).itemsize
    rows_budget = max(8, _round_down(block_budget // (d_eff * itemsize), 8))
    tn = max(8, min(max(8, _round_down(tn_max, 8)),
                    rows_budget,
                    _round_up(n_f, 8)))

    tiles_per_shard = max(1, _cdiv(n_f, num_shards * tn))
    last_block = max(0, _cdiv(n_f, tn) - 1)
    grid = (num_shards, tiles_per_shard)

    nf_arr = jnp.array([n_f], dtype=jnp.int32)

    def x_index(s, k, nf_ref):
        # Clamp so DMAs never start past the end of x; logically-empty tiles
        # are fully masked in the kernel and contribute exactly 0.
        return (jnp.minimum(s * tiles_per_shard + k, last_block), 0)

    partials = pl.pallas_call(
        cae_kernel,
        out_shape=jax.ShapeDtypeStruct((num_shards * 8, d_eff), jnp.float32),
        grid_spec=pltpu.PrefetchScalarGridSpec(
            num_scalar_prefetch=1,
            grid=grid,
            in_specs=[
                pl.BlockSpec((tn, d_eff), x_index),
                pl.BlockSpec((1, d_eff), lambda s, k, nf_ref: (0, 0)),
                pl.BlockSpec((1, d_eff), lambda s, k, nf_ref: (0, 0)),
            ],
            out_specs=pl.BlockSpec((8, d_eff), lambda s, k, nf_ref: (s, 0)),
        ),
        compiler_params=pltpu.CompilerParams(
            dimension_semantics=("parallel", "arbitrary"),
            vmem_limit_bytes=int(vmem_limit),
        ),
    )(nf_arr, xf, mu_fold, inv_s2_fold)

    # ---- tiny scalar epilogue (independent of N / done once) --------------
    item1 = jnp.sum(partials) / jnp.float32(n)
    # Numerically-stable log-det: log(prod(sigma^2)) == sum(log(sigma^2)).
    item2 = jnp.sum(jnp.log(sigma32 * sigma32))
    return (item1 + item2) * 0.5


def reference_forward(x, mu, sigma):
    if x.ndim == 1:
        x = x.reshape(1, -1)
    sigma2 = sigma.astype(jnp.float32) ** 2
    diff = x.astype(jnp.float32) - mu.astype(jnp.float32)
    item1 = jnp.mean(jnp.sum(diff * (1.0 / sigma2) * diff, axis=1))
    item2 = jnp.log(jnp.prod(sigma2))
    return (item1 + item2) / 2.0


# TODO(synk): SingleClassCaE.pdf uses scipy.stats.multivariate_normal on host;
# it is not part of forward() and is not implemented here.

if __name__ == "__main__":
    key = jax.random.PRNGKey(0)
    k1, k2, k3, k4, k5, k6 = jax.random.split(key, 6)

    # Case 1: module-init parameters (mu = zeros, sigma = ones, clipped as in
    # _reset).  D=32 exercises the lane-folding path + in-kernel row masking.
    dim, batch = 32, 8
    mu = jnp.zeros((dim,), jnp.float32)
    sigma = jnp.clip(jnp.ones((dim,), jnp.float32), EPS, 10000.0)
    x = jax.random.normal(k1, (batch, dim), jnp.float32)
    out1 = jax.block_until_ready(single_class_cae_forward(x, mu, sigma))
    ref1 = reference_forward(x, mu, sigma)
    assert jnp.allclose(out1, ref1, rtol=1e-4, atol=1e-4), (out1, ref1)

    # Case 2: "trained" parameters, D not a divisor of 128 (no folding),
    # ragged row count + small tn_max forces multiple tiles and a masked tail.
    dim2, batch2 = 160, 77
    mu2 = jax.random.normal(k2, (dim2,), jnp.float32)
    sigma2 = jnp.clip(
        jax.random.uniform(k3, (dim2,), jnp.float32, minval=0.5, maxval=1.5),
        EPS, 10000.0)
    x2 = mu2 + 0.7 * jax.random.normal(k4, (batch2, dim2), jnp.float32)
    out2 = jax.block_until_ready(
        single_class_cae_forward(x2, mu2, sigma2, tn_max=16))
    ref2 = reference_forward(x2, mu2, sigma2)
    assert jnp.allclose(out2, ref2, rtol=1e-4, atol=1e-4), (out2, ref2)

    # Case 3: 1-D input path (x.dim() == 1 in the PyTorch forward).
    x3 = jax.random.normal(k5, (dim,), jnp.float32)
    out3 = jax.block_until_ready(single_class_cae_forward(x3, mu, sigma))
    ref3 = reference_forward(x3, mu, sigma)
    assert jnp.allclose(out3, ref3, rtol=1e-4, atol=1e-4), (out3, ref3)

    # Case 4: bf16 passthrough (no wrapper upcast) + explicit num_shards=2 to
    # exercise the clamped, fully-masked shard tile path.
    batch4 = 10
    x4 = jax.random.normal(k6, (batch4, dim), jnp.float32).astype(jnp.bfloat16)
    out4 = jax.block_until_ready(
        single_class_cae_forward(x4, mu, sigma, num_shards=2))
    ref4 = reference_forward(x4, mu, sigma)
    assert jnp.allclose(out4, ref4, rtol=1e-3, atol=1e-3), (out4, ref4)

    print("KERNEL_OK")
</pallas_src>

<mosaic_0001>
module attributes {stable_mosaic.version = 11 : i64} {
  func.func @cae_kernel(%arg0: i32, %arg1: i32, %arg2: memref<1xi32, #tpu.memory_space<smem>>, %arg3: memref<8x128xf32, #tpu.memory_space<vmem>>, %arg4: memref<1x128xf32, #tpu.memory_space<vmem>>, %arg5: memref<1x128xf32, #tpu.memory_space<vmem>>, %arg6: memref<8x128xf32, #tpu.memory_space<vmem>>) attributes {dimension_semantics = [#tpu.dimension_semantics<parallel>, #tpu.dimension_semantics<arbitrary>], iteration_bounds = array<i64: 1, 1>, scalar_prefetch = 1 : i64, scratch_operands = 0 : i64, tpu.core_type = #tpu.core_type<tc>, window_params = [{transform_indices = @transform_0, window_bounds = array<i64: 8, 128>}, {pipeline_mode = #tpu.pipeline_mode<synchronous>, transform_indices = @transform_1, window_bounds = array<i64: 1, 128>}, {pipeline_mode = #tpu.pipeline_mode<synchronous>, transform_indices = @transform_2, window_bounds = array<i64: 1, 128>}, {transform_indices = @transform_3, window_bounds = array<i64: 8, 128>}]} {
    %c0_i32 = arith.constant 0 : i32
    %0 = arith.cmpi eq, %arg1, %c0_i32 : i32
    %1 = arith.extui %0 : i1 to i32
    %c0_i32_0 = arith.constant 0 : i32
    %2 = arith.cmpi ne, %1, %c0_i32_0 : i32
    scf.if %2 {
      %cst = arith.constant 0.000000e+00 : f32
      %22 = vector.broadcast %cst : f32 to vector<8x128xf32>
      %c0_10 = arith.constant 0 : index
      %c0_11 = arith.constant 0 : index
      %23 = vector.load %arg6[%c0_10, %c0_11] : memref<8x128xf32, #tpu.memory_space<vmem>>, vector<8x128xf32>
      tpu.vector_store %arg6[%c0_10, %c0_11], %22 {strides = array<i32>} : memref<8x128xf32, #tpu.memory_space<vmem>>, vector<8x128xf32>,
    } else {
    }
    %c0 = arith.constant 0 : index
    %c0_1 = arith.constant 0 : index
    %3 = vector.load %arg3[%c0, %c0_1] : memref<8x128xf32, #tpu.memory_space<vmem>>, vector<8x128xf32>
    %c0_2 = arith.constant 0 : index
    %c0_3 = arith.constant 0 : index
    %4 = vector.load %arg4[%c0_2, %c0_3] : memref<1x128xf32, #tpu.memory_space<vmem>>, vector<1x128xf32>
    %5 = vector.broadcast %4 : vector<1x128xf32> to vector<8x128xf32>
    %6 = arith.subf %3, %5 : vector<8x128xf32>
    %c0_4 = arith.constant 0 : index
    %c0_5 = arith.constant 0 : index
    %7 = vector.load %arg5[%c0_4, %c0_5] : memref<1x128xf32, #tpu.memory_space<vmem>>, vector<1x128xf32>
    %8 = vector.broadcast %7 : vector<1x128xf32> to vector<8x128xf32>
    %9 = arith.mulf %6, %8 : vector<8x128xf32>
    %10 = arith.mulf %9, %6 : vector<8x128xf32>
    %c0_6 = arith.constant 0 : index
    %11 = memref.load %arg2[%c0_6] : memref<1xi32, #tpu.memory_space<smem>>
    %c1_i32 = arith.constant 1 : i32
    %12 = arith.muli %arg0, %c1_i32 : i32
    %13 = arith.addi %12, %arg1 : i32
    %c8_i32 = arith.constant 8 : i32
    %14 = arith.muli %13, %c8_i32 : i32
    %c8_i32_7 = arith.constant 8 : i32
    %15 = arith.addi %14, %c8_i32_7 : i32
    %16 = arith.cmpi sgt, %15, %11 : i32
    %17 = arith.extui %16 : i1 to i32
    %c0_i32_8 = arith.constant 0 : i32
    %18 = arith.cmpi ne, %17, %c0_i32_8 : i32
    scf.if %18 {
      %22 = tpu.iota {dimensions = array<i32: 0>} : vector<8x1xi32>
      %23 = vector.broadcast %14 : i32 to vector<8x1xi32>
      %24 = arith.addi %22, %23 : vector<8x1xi32>
      %25 = vector.broadcast %11 : i32 to vector<8x1xi32>
      %26 = arith.cmpi slt, %24, %25 : vector<8x1xi32>
      %cst = arith.constant 0.000000e+00 : f32
      %27 = vector.shape_cast %26 : vector<8x1xi1> to vector<8x1xi1>
      %28 = vector.broadcast %27 : vector<8x1xi1> to vector<8x128xi1>
      %29 = vector.broadcast %cst : f32 to vector<8x128xf32>
      %30 = arith.select %28, %10, %29 : vector<8x128xi1>, vector<8x128xf32>
      %c0_10 = arith.constant 0 : index
      %c0_11 = arith.constant 0 : index
      %31 = vector.load %arg6[%c0_10, %c0_11] : memref<8x128xf32, #tpu.memory_space<vmem>>, vector<8x128xf32>
      %32 = vector.shape_cast %30 : vector<8x128xf32> to vector<1x8x128xf32>
      %cst_12 = arith.constant dense<0.000000e+00> : vector<8x128xf32>
      %33 = vector.multi_reduction <add>, %32, %cst_12 [0] : vector<1x8x128xf32> to vector<8x128xf32>
      %34 = arith.addf %31, %33 : vector<8x128xf32>
      %c0_13 = arith.constant 0 : index
      %c0_14 = arith.constant 0 : index
      %35 = vector.load %arg6[%c0_13, %c0_14] : memref<8x128xf32, #tpu.memory_space<vmem>>, vector<8x128xf32>
      tpu.vector_store %arg6[%c0_13, %c0_14], %34 {strides = array<i32>} : memref<8x128xf32, #tpu.memory_space<vmem>>, vector<8x128xf32>,
    } else {
    }
    %true = arith.constant true
    %19 = arith.xori %16, %true : i1
    %20 = arith.extui %19 : i1 to i32
    %c0_i32_9 = arith.constant 0 : i32
    %21 = arith.cmpi ne, %20, %c0_i32_9 : i32
    scf.if %21 {
      %c0_10 = arith.constant 0 : index
      %c0_11 = arith.constant 0 : index
      %22 = vector.load %arg6[%c0_10, %c0_11] : memref<8x128xf32, #tpu.memory_space<vmem>>, vector<8x128xf32>
      %23 = vector.shape_cast %10 : vector<8x128xf32> to vector<1x8x128xf32>
      %cst = arith.constant dense<0.000000e+00> : vector<8x128xf32>
      %24 = vector.multi_reduction <add>, %23, %cst [0] : vector<1x8x128xf32> to vector<8x128xf32>
      %25 = arith.addf %22, %24 : vector<8x128xf32>
      %c0_12 = arith.constant 0 : index
      %c0_13 = arith.constant 0 : index
      %26 = vector.load %arg6[%c0_12, %c0_13] : memref<8x128xf32, #tpu.memory_space<vmem>>, vector<8x128xf32>
      tpu.vector_store %arg6[%c0_12, %c0_13], %25 {strides = array<i32>} : memref<8x128xf32, #tpu.memory_space<vmem>>, vector<8x128xf32>,
    } else {
    }
    return
  }
  func.func @transform_0(%arg0: i32, %arg1: i32, %arg2: memref<1xi32, #tpu.memory_space<smem>>) -> (i32, i32) {
    %c1_i32 = arith.constant 1 : i32
    %0 = arith.muli %arg0, %c1_i32 : i32
    %1 = arith.addi %0, %arg1 : i32
    %c0_i32 = arith.constant 0 : i32
    %2 = arith.minsi %1, %c0_i32 : i32
    %c0_i32_0 = arith.constant 0 : i32
    %c0_i32_1 = arith.constant 0 : i32
    return %2, %c0_i32_0 : i32, i32
  }
  func.func @transform_1(%arg0: i32, %arg1: i32, %arg2: memref<1xi32, #tpu.memory_space<smem>>) -> (i32, i32) {
    %c0_i32 = arith.constant 0 : i32
    %c0_i32_0 = arith.constant 0 : i32
    %c0_i32_1 = arith.constant 0 : i32
    return %c0_i32, %c0_i32_0 : i32, i32
  }
  func.func @transform_2(%arg0: i32, %arg1: i32, %arg2: memref<1xi32, #tpu.memory_space<smem>>) -> (i32, i32) {
    %c0_i32 = arith.constant 0 : i32
    %c0_i32_0 = arith.constant 0 : i32
    %c0_i32_1 = arith.constant 0 : i32
    return %c0_i32, %c0_i32_0 : i32, i32
  }
  func.func @transform_3(%arg0: i32, %arg1: i32, %arg2: memref<1xi32, #tpu.memory_space<smem>>) -> (i32, i32) {
    %c0_i32 = arith.constant 0 : i32
    %c0_i32_0 = arith.constant 0 : i32
    return %arg0, %c0_i32 : i32, i32
  }
}

</mosaic_0001>

<bundles_post_ra>
// kernel: tpu_custom_call.1
= control target key start
LH: loop header
LB: loop body
LE: loop exit
PB: predicated region body
PF: predicated region fallthrough
CT: control target
= control target key end

     0   :  { %10 = vsyncpa [#allocation5], 0  ;;  %v161_v2 = vmov 0.0   ;;  %s209_s0 = inlined_call_operand.<no memory space> [shape: s32[1], index: 0, kind: input, shape index: {}]   ;;  %s210_s1 = inlined_call_operand.vmem [shape: f32[2,128], index: 1, kind: input, shape index: {}]   ;;  %s211_s2 = inlined_call_operand.vmem [shape: f32[1,128], index: 2, kind: input, shape index: {}]   ;;  %s212_s3 = inlined_call_operand.vmem [shape: f32[1,128], index: 3, kind: input, shape index: {}]   ;;  %s213_s4 = inlined_call_operand.hbm [shape: f32[8,128], index: 4, kind: output, shape index: {}]  }
   0x1   :  { %v64_v0 = vld [vmem:[%s210_s1] sm:$0xff]  ;;  %63 = vst [vmem:[#allocation4] sm:$0xff] %v161_v2  ;;  %p134_p0 = scmp.ge.s32.totalorder %s209_s0, 8 }
   0x2   :  { %v131_v1 = vld [vmem:[%s211_s2] ss:$0 sm:$0xff] }
   0x3   :  { %v72_v3 = vsub.f32 %v64_v0, %v131_v1  ;;  %v132_v4 = vld [vmem:[%s212_s3] ss:$0 sm:$0xff]  ;;  %89 = sbr.rel (%p134_p0) target bundleno = 17 (0x11), region = 21 }
   0x5   :  { %v80_v5 = vmul.f32 %v132_v4, %v72_v3 }
   0x7   :  { %v81_v6 = vmul.f32 %v80_v5, %v72_v3 }
   0x8   :  { %v90_v7 = vlaneseq  ;;  %v94_v8 = vstv %s209_s0  ;;  %v99_v10 = vld [vmem:[#allocation4] sm:$0xff] }
   0xa   :  { %v91_v9 = vshrl.u32 %v90_v7, 7 }
   0xc   :  { %vm95_vm0 = vcmp.lt.s32.totalorder %v91_v9, %v94_v8 }
   0xd   :  { %v98_v11 = vsel %vm95_vm0, %v81_v6, 0.0 }
   0xe   :  { %v101_v12 = vadd.f32 %v99_v10, %v98_v11 }
  0x10   :  { %102 = vst [vmem:[#allocation4] sm:$0xff] %v101_v12 }
  0x11 PF:  { %p136_p1 = scmp.lt.s32.totalorder %s209_s0, 8 }
  0x13   :  { %106 = sbr.rel (%p136_p1) target bundleno = 28 (0x1c), region = 25 }
  0x18   :  { %v107_v13 = vld [vmem:[#allocation4] sm:$0xff] }
  0x19   :  { %v109_v14 = vadd.f32 %v107_v13, %v81_v6 }
  0x1b   :  { %110 = vst [vmem:[#allocation4] sm:$0xff] %v109_v14 }
  0x1c PF:  { %s162_s24 = smov [#allocation4]  }
  0x1d   :  { %s117_s25 = sshll.u32 %s162_s24, 4  ;;  %s118_s25 = int_to_ptr.vmem [resolvable:$true] %s117_s25 }
  0x1e   :  { %s139_s26 = scalar_lea.vmem %s118_s25, 128  ;;  %p144_p3 = scmp.lt.s32.totalorder %s118_s25, %s118_s25 }
  0x1f   :  { %p140_p2 = scmp.ne.s32.totalorder %s118_s25, %s139_s26  ;;  %p145_p4 = scmp.lt.s32.totalorder %s139_s26, %s139_s26 }
  0x21   :  { %p146_p5 = por %p145_p4, %p144_p3 }
  0x23   :  { %p147_p6 = pnand %p146_p5, %p140_p2 }
  0x25   :  { %150 = shalt.err (!%p147_p6)
}
  0x26   :  { %120 = dma.vmem_to_hbm [thread:$0]  %s118_s25, 128, %s213_s4, [#allocation5]  }
  0x27   :  { %159 = dma.done.wait [#allocation5], 128  }
  0x28   :  { %160 = vsyncadd [#allocation5], 4294967168 }
  0x29   :  { %124 = vsyncpa [#allocation5], 1 }

</bundles_post_ra>
